<compile_context>
chip_gen: v6e
topology: v6e:2x2x1
jax: 0.10.0
libtpu: 0.0.40
codegen_flags: <defaults>
</compile_context>

<pallas_src>
import functools

import jax
import jax.numpy as jnp
from jax.experimental import pallas as pl
from jax.experimental.pallas import tpu as pltpu

LANE = 128
MAX_BLOCK_BYTES = 4 << 20        # 4 MiB per block per operand (8192 rows f32)
MIN_KERNEL_BYTES = 256 * 1024    # below this, fused XLA elementwise wins
TARGET_GRID_STEPS = 8            # aim for >= ~8 steps so DMA actually pipelines


def _round_up(n: int, m: int) -> int:
    return ((n + m - 1) // m) * m


def _sublane(itemsize: int) -> int:
    # Minimum sublane tiling per element width (f32:8, bf16:16, int8/fp8:32).
    return {4: 8, 2: 16, 1: 32}.get(itemsize, 8)


def _leaky_relu_kernel(x_ref, o_ref, *, negative_slope: float):
    x = x_ref[...]
    pos = jnp.maximum(x, 0)          # clip(x, min=0)
    neg = jnp.minimum(x, 0)          # clip(x, max=0)
    # 4 VALU ops/vreg; binding resource is HBM DMA, so no further micro-opt.
    o_ref[...] = (pos + negative_slope * neg).astype(o_ref.dtype)


def _leaky_relu_2d(x2d: jax.Array, negative_slope: float) -> jax.Array:
    rows = x2d.shape[0]
    itemsize = jnp.dtype(x2d.dtype).itemsize
    sub = _sublane(itemsize)

    # Largest block: MAX_BLOCK_BYTES per operand, rounded down to sublane tile.
    max_tm = max(sub, (MAX_BLOCK_BYTES // (LANE * itemsize)) // sub * sub)
    # Target ~TARGET_GRID_STEPS steps (so input/output DMA pipelines and the
    # grid can shard across TensorCores), but keep blocks >= 512 rows to
    # amortize the ~0.35us per-grid-step fixed cost.
    tm = min(max_tm, max(512, _round_up(pl.cdiv(rows, TARGET_GRID_STEPS), sub)))
    tm = min(tm, _round_up(rows, sub))   # never bigger than the (padded) array
    grid = (pl.cdiv(rows, tm),)

    kernel = functools.partial(_leaky_relu_kernel, negative_slope=negative_slope)
    return pl.pallas_call(
        kernel,
        out_shape=jax.ShapeDtypeStruct(x2d.shape, x2d.dtype),
        grid_spec=pltpu.PrefetchScalarGridSpec(
            num_scalar_prefetch=0,
            grid=grid,
            in_specs=[pl.BlockSpec((tm, LANE), lambda i: (i, 0))],
            out_specs=pl.BlockSpec((tm, LANE), lambda i: (i, 0)),
        ),
        compiler_params=pltpu.CompilerParams(
            dimension_semantics=("parallel",),
            # 2 operands x 2 double-buffers x 4 MiB = 16 MiB; 32 MiB is safe on
            # v5e (128 MiB phys), v6e (128 MiB phys) and v7x (64 MiB phys).
            vmem_limit_bytes=32 << 20,
        ),
    )(x2d)


def _leaky_relu_jnp(x: jax.Array, negative_slope: float) -> jax.Array:
    return (jnp.maximum(x, 0) + negative_slope * jnp.minimum(x, 0)).astype(x.dtype)


def custom_leaky_relu(x: jax.Array, negative_slope: float = 0.01,
                      *, min_kernel_bytes: int = MIN_KERNEL_BYTES) -> jax.Array:
    n = x.size
    if n == 0:
        return x
    itemsize = jnp.dtype(x.dtype).itemsize
    # Ragged (non lane-divisible) or tiny inputs: plain XLA elementwise is
    # already at the HBM roofline (2N bytes moved) and beats any pad/concat
    # fixup (>= 4N bytes) or the fixed pallas_call launch cost.
    if (n % LANE != 0) or (n * itemsize < min_kernel_bytes):
        return _leaky_relu_jnp(x, negative_slope)
    x2d = x.reshape(n // LANE, LANE)   # pure view: lane-dense, no copy
    return _leaky_relu_2d(x2d, negative_slope).reshape(x.shape)


if __name__ == "__main__":
    key = jax.random.PRNGKey(0)
    k1, k2 = jax.random.split(key)
    negative_slope = 0.01

    # Small NCHW demo input matching the PyTorch module's typical use.
    x_small = jax.random.normal(k1, (2, 4, 16, 16), dtype=jnp.float32)
    # Force the Pallas path even for this tiny tensor so the kernel is exercised.
    out_small = jax.block_until_ready(
        custom_leaky_relu(x_small, negative_slope, min_kernel_bytes=0))
    ref_small = jnp.clip(x_small, 0, None) + negative_slope * jnp.clip(x_small, None, 0)
    assert out_small.shape == x_small.shape
    assert out_small.dtype == x_small.dtype
    assert jnp.allclose(out_small, ref_small, atol=1e-6, rtol=1e-6)

    # Larger input under default policy -> multi-step, pipelined Pallas grid.
    x_big = jax.random.normal(k2, (8, 32, 32, 32), dtype=jnp.float32)  # 1 MiB
    out_big = jax.block_until_ready(custom_leaky_relu(x_big, negative_slope))
    ref_big = jnp.clip(x_big, 0, None) + negative_slope * jnp.clip(x_big, None, 0)
    assert jnp.allclose(out_big, ref_big, atol=1e-6, rtol=1e-6)

    # Ragged shape: exercises the roofline-optimal XLA fallback path.
    x_rag = jax.random.normal(key, (3, 5, 7), dtype=jnp.float32)
    out_rag = jax.block_until_ready(custom_leaky_relu(x_rag, negative_slope))
    ref_rag = jnp.clip(x_rag, 0, None) + negative_slope * jnp.clip(x_rag, None, 0)
    assert jnp.allclose(out_rag, ref_rag, atol=1e-6, rtol=1e-6)

    print("KERNEL_OK")
</pallas_src>

<mosaic_0001>
module attributes {stable_mosaic.version = 11 : i64} {
  func.func @_leaky_relu_kernel(%arg0: i32, %arg1: memref<16x128xf32, #tpu.memory_space<vmem>>, %arg2: memref<16x128xf32, #tpu.memory_space<vmem>>) attributes {dimension_semantics = [#tpu.dimension_semantics<parallel>], iteration_bounds = array<i64: 1>, scalar_prefetch = 0 : i64, scratch_operands = 0 : i64, tpu.core_type = #tpu.core_type<tc>, window_params = [{transform_indices = @transform_0, window_bounds = array<i64: 16, 128>}, {transform_indices = @transform_1, window_bounds = array<i64: 16, 128>}]} {
    %c0 = arith.constant 0 : index
    %c0_0 = arith.constant 0 : index
    %0 = vector.load %arg1[%c0, %c0_0] : memref<16x128xf32, #tpu.memory_space<vmem>>, vector<16x128xf32>
    %cst = arith.constant 0.000000e+00 : f32
    %1 = vector.broadcast %cst : f32 to vector<16x128xf32>
    %2 = arith.maximumf %0, %1 : vector<16x128xf32>
    %cst_1 = arith.constant 0.000000e+00 : f32
    %3 = vector.broadcast %cst_1 : f32 to vector<16x128xf32>
    %4 = arith.minimumf %0, %3 : vector<16x128xf32>
    %cst_2 = arith.constant 0.00999999977 : f32
    %5 = vector.broadcast %cst_2 : f32 to vector<16x128xf32>
    %6 = arith.mulf %5, %4 : vector<16x128xf32>
    %7 = arith.addf %2, %6 : vector<16x128xf32>
    %c0_3 = arith.constant 0 : index
    %c0_4 = arith.constant 0 : index
    %8 = vector.load %arg2[%c0_3, %c0_4] : memref<16x128xf32, #tpu.memory_space<vmem>>, vector<16x128xf32>
    tpu.vector_store %arg2[%c0_3, %c0_4], %7 {strides = array<i32>} : memref<16x128xf32, #tpu.memory_space<vmem>>, vector<16x128xf32>,
    return
  }
  func.func @transform_0(%arg0: i32) -> (i32, i32) {
    %c0_i32 = arith.constant 0 : i32
    %c0_i32_0 = arith.constant 0 : i32
    return %arg0, %c0_i32 : i32, i32
  }
  func.func @transform_1(%arg0: i32) -> (i32, i32) {
    %c0_i32 = arith.constant 0 : i32
    %c0_i32_0 = arith.constant 0 : i32
    return %arg0, %c0_i32 : i32, i32
  }
}

</mosaic_0001>

<bundles_post_ra>
// kernel: tpu_custom_call.1
= control target key start
LH: loop header
LB: loop body
LE: loop exit
PB: predicated region body
PF: predicated region fallthrough
CT: control target
= control target key end

     0   :  { %6 = vsyncpa [#allocation3], 0  ;;  %s126_s0 = inlined_call_operand.hbm [shape: f32[16,128], index: 0, kind: input, shape index: {}]   ;;  %s127_s1 = inlined_call_operand.hbm [shape: f32[16,128], index: 1, kind: output, shape index: {}]  }
   0x1   :  { %7 = vsyncpa [#allocation4], 0  ;;  %s100_s6 = smov [#allocation2]  }
   0x2   :  { %s13_s7 = sshll.u32 %s100_s6, 4  ;;  %s14_s7 = int_to_ptr.vmem [resolvable:$true] %s13_s7 }
   0x3   :  { %s64_s8 = scalar_lea.vmem %s14_s7, 256  ;;  %p69_p1 = scmp.lt.s32.totalorder %s14_s7, %s14_s7 }
   0x4   :  { %p65_p0 = scmp.ne.s32.totalorder %s14_s7, %s64_s8  ;;  %p70_p2 = scmp.lt.s32.totalorder %s64_s8, %s64_s8 }
   0x6   :  { %p71_p3 = por %p70_p2, %p69_p1 }
   0x8   :  { %p72_p4 = pnand %p71_p3, %p65_p0 }
   0xa   :  { %75 = shalt.err (!%p72_p4)
}
   0xb   :  { %s101_s9 = smov 128   ;;  %s102_s10 = smov 8  }
   0xc   :  { %19 = dma.hbm_to_vmem [thread:$0]  %s126_s0, 256, %s14_s7, [#allocation3], %s101_s9, %s101_s9, %s102_s10  }
   0xd   :  { %96 = dma.done.wait [#allocation3], 256  }
   0xe   :  { %97 = vsyncadd [#allocation3], 4294967040  ;;  %v23_v0 = vld [vmem:[#allocation2] sm:$0xff]  ;;  %v24_v1 = vld [vmem:[#allocation2 + $0x8] sm:$0xff]  ;;  %s103_s13 = smov [#allocation5]  }
   0xf   :  { %v25_v2 = vmax.f32 %v23_v0, 0.0  ;;  %v27_v3 = vmin.f32 %v23_v0, 0.0  ;;  %v26_v4 = vmax.f32 %v24_v1, 0.0  ;;  %v28_v5 = vmin.f32 %v24_v1, 0.0  ;;  %s40_s14 = sshll.u32 %s103_s13, 4  ;;  %s41_s14 = int_to_ptr.vmem [resolvable:$true] %s40_s14 }
  0x10   :  { %s76_s15 = scalar_lea.vmem %s41_s14, 256  ;;  %p81_p6 = scmp.lt.s32.totalorder %s41_s14, %s41_s14 }
  0x11   :  { %v29_v6 = vmul.f32 0.01, %v27_v3  ;;  %v30_v7 = vmul.f32 0.01, %v28_v5  ;;  %p77_p5 = scmp.ne.s32.totalorder %s41_s14, %s76_s15  ;;  %p82_p7 = scmp.lt.s32.totalorder %s76_s15, %s76_s15 }
  0x13   :  { %v31_v8 = vadd.f32 %v29_v6, %v25_v2  ;;  %v32_v9 = vadd.f32 %v30_v7, %v26_v4  ;;  %p83_p8 = por %p82_p7, %p81_p6 }
  0x15   :  { %33 = vst [vmem:[#allocation5] sm:$0xff] %v31_v8  ;;  %34 = vst [vmem:[#allocation5 + $0x8] sm:$0xff] %v32_v9  ;;  %p84_p9 = pnand %p83_p8, %p77_p5 }
  0x17   :  { %87 = shalt.err (!%p84_p9)
}
  0x18   :  { %46 = dma.vmem_to_hbm [thread:$0]  %s41_s14, 256, %s127_s1, [#allocation4], %s101_s9, %s101_s9, %s102_s10  }
  0x19   :  { %98 = dma.done.wait [#allocation4], 256  }
  0x1a   :  { %99 = vsyncadd [#allocation4], 4294967040 }
  0x1b   :  { %50 = vsyncpa [#allocation3], 1 }
  0x1c   :  { %51 = vsyncpa [#allocation4], 1 }

</bundles_post_ra>
